<compile_context>
chip_gen: v5e
topology: v5e:2x2
jax: 0.10.0
libtpu: 0.0.40
codegen_flags: <defaults>
</compile_context>

<pallas_src>
import functools

import jax
import jax.numpy as jnp
from jax.experimental import pallas as pl
from jax.experimental.pallas import tpu as pltpu


def _l2n_kernel(x_ref, o_ref, *, eps):
    # Block is either (NB, C, S, 128) or (NB, C, T); reduction is over axis=1
    # (channels) with keepdim semantics in both cases.
    x = x_ref[...]
    xf = x.astype(jnp.float32)
    sumsq = jnp.sum(xf * xf, axis=1, keepdims=True)
    norm = jnp.sqrt(sumsq)
    # Exact reciprocal; eps is added to the norm (NOT folded into an rsqrt).
    inv = pl.reciprocal(norm + eps, approx=False)
    o_ref[...] = (xf * inv).astype(o_ref.dtype)


def l2n(x, eps=1e-6):
    """x: (N, C, H, W) -> x / (||x||_2 along C (keepdim) + eps)."""
    N, C, H, W = x.shape
    HW = H * W
    dtype = x.dtype
    itemsize = jnp.dtype(dtype).itemsize

    LANE = 128
    SUB = max(8, 32 // itemsize)  # sublane multiple for this dtype

    # Physical VMEM per core (v5e/v6e: 128 MiB, v7x: 64 MiB).
    try:
        info = pltpu.get_tpu_info()
        vmem_cap = int(getattr(info, "vmem_capacity_bytes", 0)) or (64 << 20)
    except Exception:  # pragma: no cover - conservative fallback
        vmem_cap = 64 << 20

    # Per-element footprint: double-buffered in + out blocks in x.dtype
    # (2 + 2) plus ~2 full-block f32 temporaries from the upcast/square/scale.
    bytes_per_elem = 4 * itemsize + 8
    footprint_budget = min(vmem_cap // 4, 16 << 20)
    # ~1 MiB of payload per grid step amortizes fixed per-step overhead; >2 MiB
    # of dtype bytes per block buys nothing for a mem-bound op.
    target_block_bytes = 1 << 20
    block_elems_max = max(
        LANE * SUB,
        min(footprint_budget // bytes_per_elem, (2 << 20) // itemsize),
    )

    if HW % LANE == 0:
        # ---- Dense path: (N, C, SL, 128), channel reduce on the VPU. ----
        SL = HW // LANE
        s_max = max(1, block_elems_max // (C * LANE))
        if s_max >= SL:
            s_blk = SL  # full spatial extent (allowed even if not 8-aligned)
        else:
            s_blk = max(SUB, (s_max // SUB) * SUB)
        n_sp = int(pl.cdiv(SL, s_blk))

        nb = 1
        if n_sp == 1:
            per_row = C * s_blk * LANE  # elements per batch row per block
            nb = int(min(
                N,
                max(1, block_elems_max // per_row),
                max(1, pl.cdiv(target_block_bytes, per_row * itemsize)),
            ))
            if nb >= N and N > 1:
                nb = int(pl.cdiv(N, 2))  # keep >= 2 grid steps (v7x megacore)

        grid = (int(pl.cdiv(N, nb)), n_sp)
        x_in = x.reshape(N, C, SL, LANE)  # free (contiguous) reshape
        block = (nb, C, s_blk, LANE)
        index_map = lambda b, t: (b, 0, t, 0)
        out_struct = jax.ShapeDtypeStruct((N, C, SL, LANE), dtype)
        block_elems = nb * C * s_blk * LANE
    else:
        # ---- Ragged path: (N, C, HW), Pallas masks the last spatial tile. ----
        if HW <= LANE:
            t_hw = HW  # full extent -> no lane-divisibility requirement
        else:
            t_max = max(LANE, block_elems_max // C)
            t_hw = max(LANE, (t_max // LANE) * LANE)
            t_hw = min(t_hw, (HW // LANE) * LANE)
        n_sp = int(pl.cdiv(HW, t_hw))

        nb = 1
        if n_sp == 1:
            per_row = C * t_hw
            nb = int(min(
                N,
                max(1, block_elems_max // per_row),
                max(1, pl.cdiv(target_block_bytes, per_row * itemsize)),
            ))
            if nb >= N and N > 1:
                nb = int(pl.cdiv(N, 2))

        grid = (int(pl.cdiv(N, nb)), n_sp)
        x_in = x.reshape(N, C, HW)  # free (contiguous) reshape
        block = (nb, C, t_hw)
        index_map = lambda b, t: (b, 0, t)
        out_struct = jax.ShapeDtypeStruct((N, C, HW), dtype)
        block_elems = nb * C * t_hw

    # Explicit scoped-VMEM limit: above v5e's 16 MiB default, below v7x's
    # 64 MiB physical (and bumped if a large-C minimal block needs more).
    footprint = block_elems * bytes_per_elem
    vmem_limit = int(min(max(48 << 20, footprint + (8 << 20)),
                         (vmem_cap * 3) // 4))

    kernel = functools.partial(_l2n_kernel, eps=eps)
    cost = pl.CostEstimate(
        flops=3 * N * C * HW,            # square, accumulate, scale
        transcendentals=2 * N * HW,      # sqrt + reciprocal per pixel
        bytes_accessed=2 * N * C * HW * itemsize,
    )

    out = pl.pallas_call(
        kernel,
        out_shape=out_struct,
        grid_spec=pltpu.PrefetchScalarGridSpec(
            num_scalar_prefetch=0,
            grid=grid,
            in_specs=[pl.BlockSpec(block, index_map)],
            out_specs=pl.BlockSpec(block, index_map),
        ),
        compiler_params=pltpu.CompilerParams(
            dimension_semantics=("parallel", "parallel"),
            vmem_limit_bytes=vmem_limit,
        ),
        cost_estimate=cost,
    )(x_in)

    return out.reshape(N, C, H, W)


def _ref_l2n(x, eps=1e-6):
    return x / (jnp.linalg.norm(x, ord=2, axis=1, keepdims=True) + eps)


if __name__ == "__main__":
    key = jax.random.PRNGKey(0)
    # Small NCHW input consistent with the module's expectations.
    x = jax.random.normal(key, (2, 4, 16, 16), dtype=jnp.float32)

    y = jax.block_until_ready(l2n(x, eps=1e-6))
    assert y.shape == x.shape
    assert jnp.allclose(y, _ref_l2n(x, 1e-6), atol=1e-5, rtol=1e-5)

    # Ragged spatial extent (14x14 = 196: not a multiple of 128) exercises the
    # masked-last-tile path that replaces the old wrapper pad/slice.
    x2 = jax.random.normal(jax.random.PRNGKey(1), (2, 4, 14, 14),
                           dtype=jnp.float32)
    y2 = jax.block_until_ready(l2n(x2, eps=1e-6))
    assert y2.shape == x2.shape
    assert jnp.allclose(y2, _ref_l2n(x2, 1e-6), atol=1e-5, rtol=1e-5)

    print("KERNEL_OK")
</pallas_src>

<mosaic_0001>
module attributes {stable_mosaic.version = 11 : i64} {
  func.func @_l2n_kernel(%arg0: i32, %arg1: i32, %arg2: memref<1x4x2x128xf32, #tpu.memory_space<vmem>>, %arg3: memref<1x4x2x128xf32, #tpu.memory_space<vmem>>) attributes {dimension_semantics = [#tpu.dimension_semantics<parallel>, #tpu.dimension_semantics<parallel>], iteration_bounds = array<i64: 2, 1>, scalar_prefetch = 0 : i64, scratch_operands = 0 : i64, tpu.core_type = #tpu.core_type<tc>, window_params = [{transform_indices = @transform_0, window_bounds = array<i64: 1, 4, 2, 128>}, {transform_indices = @transform_1, window_bounds = array<i64: 1, 4, 2, 128>}]} {
    %c0 = arith.constant 0 : index
    %c0_0 = arith.constant 0 : index
    %c0_1 = arith.constant 0 : index
    %c0_2 = arith.constant 0 : index
    %0 = vector.load %arg2[%c0, %c0_0, %c0_1, %c0_2] : memref<1x4x2x128xf32, #tpu.memory_space<vmem>>, vector<1x4x2x128xf32>
    %1 = arith.mulf %0, %0 : vector<1x4x2x128xf32>
    %cst = arith.constant dense<0.000000e+00> : vector<1x2x128xf32>
    %2 = vector.multi_reduction <add>, %1, %cst [1] : vector<1x4x2x128xf32> to vector<1x2x128xf32>
    %3 = vector.shape_cast %2 : vector<1x2x128xf32> to vector<1x1x2x128xf32>
    %4 = math.sqrt %3 : vector<1x1x2x128xf32>
    %cst_3 = arith.constant 9.99999997E-7 : f32
    %5 = vector.broadcast %cst_3 : f32 to vector<1x1x2x128xf32>
    %6 = arith.addf %4, %5 : vector<1x1x2x128xf32>
    %7 = tpu.reciprocal %6 : vector<1x1x2x128xf32> -> vector<1x1x2x128xf32>
    %8 = vector.broadcast %7 : vector<1x1x2x128xf32> to vector<1x4x2x128xf32>
    %9 = arith.mulf %0, %8 : vector<1x4x2x128xf32>
    %c0_4 = arith.constant 0 : index
    %c0_5 = arith.constant 0 : index
    %c0_6 = arith.constant 0 : index
    %c0_7 = arith.constant 0 : index
    %10 = vector.load %arg3[%c0_4, %c0_5, %c0_6, %c0_7] : memref<1x4x2x128xf32, #tpu.memory_space<vmem>>, vector<1x4x2x128xf32>
    tpu.vector_store %arg3[%c0_4, %c0_5, %c0_6, %c0_7], %9 {strides = array<i32>} : memref<1x4x2x128xf32, #tpu.memory_space<vmem>>, vector<1x4x2x128xf32>,
    return
  }
  func.func @transform_0(%arg0: i32, %arg1: i32) -> (i32, i32, i32, i32) {
    %c0_i32 = arith.constant 0 : i32
    %c0_i32_0 = arith.constant 0 : i32
    %c0_i32_1 = arith.constant 0 : i32
    return %arg0, %c0_i32, %arg1, %c0_i32_0 : i32, i32, i32, i32
  }
  func.func @transform_1(%arg0: i32, %arg1: i32) -> (i32, i32, i32, i32) {
    %c0_i32 = arith.constant 0 : i32
    %c0_i32_0 = arith.constant 0 : i32
    %c0_i32_1 = arith.constant 0 : i32
    return %arg0, %c0_i32, %arg1, %c0_i32_0 : i32, i32, i32, i32
  }
}

</mosaic_0001>

<bundles_post_ra>
// kernel: tpu_custom_call.1
= control target key start
LH: loop header
LB: loop body
LE: loop exit
PB: predicated region body
PF: predicated region fallthrough
CT: control target
= control target key end

     0   :  { %6 = vsyncpa [#allocation3], 0  ;;  %s646_s0 = inlined_call_operand.hbm [shape: f32[2,4,2,128], index: 0, kind: input, shape index: {}]   ;;  %s647_s1 = inlined_call_operand.hbm [shape: f32[2,4,2,128], index: 1, kind: output, shape index: {}]  }
   0x1   :  { %8 = vsyncpa [#allocation3 + $0x1], 0 }
   0x2   :  { %9 = vsyncpa [#allocation4], 0 }
   0x3   :  { %11 = vsyncpa [#allocation4 + $0x1], 0  ;;  %s522_s6 = smov 0   ;;  %s524_s7 = smov 0  }
   0x4   :  { %s526_s8 = smov 0   ;;  %s528_s9 = smov 0  }
   0x5   :  { %s530_s10 = smov 0   ;;  %s532_s11 = smov 0  }
   0x6 LB: > { %s307_s12 = sadd.s32 4294967295, %s506_s11   ;;  %s308_s13 = sadd.s32 4294967294, %s506_s11   ;;  %s506_s11 = sphi %s532_s11, %s17_s11   ;;  %s502_s10 = sphi %s530_s10, %s656_s10   ;;  %s498_s9 = sphi %s528_s9, %s655_s9   ;;  %s494_s8 = sphi %s526_s8, %s654_s8   ;;  %s490_s7 = sphi %s524_s7, %s653_s7   ;;  %s486_s6 = sphi %s522_s6, %s652_s6  }
   0x7   : > { %s29_s14 = sadd.s32 1, %s502_s10  ;;  %s38_s15 = sadd.s32 1, %s494_s8 }
   0x8   : > { %p31_p0 = scmp.ge.s32.totalorder %s29_s14, 2  ;;  %p45_p1 = scmp.ne.s32.totalorder %s494_s8, %s490_s7 }
   0x9   : > { %p46_p2 = scmp.eq.s32.totalorder %s506_s11, 0  ;;  %p51_p3 = scmp.ne.s32.totalorder %s490_s7, %s486_s6 }
   0xa   : > { %s658_s14 = smov (%p31_p0, %s29_s14), 0  ;;  %p52_p5 = scmp.eq.s32.totalorder %s307_s12, 0 }
   0xb   : > { %p563_p4 = por %p46_p2, %p45_p1  ;;  %s33_s17 = ssub.s32 %s502_s10, %s658_s14 }
   0xc   : > { %p77_p6 = scmp.eq.s32.totalorder %s307_s12, 1  ;;  %p36_p7 = scmp.eq.s32.totalorder %s33_s17, 0 }
   0xd   : > { %p569_p8 = por %p52_p5, %p51_p3  ;;  %p83_p10 = scmp.eq.s32.totalorder %s308_s13, 1 }
   0xe   : > { %p573_p9 = por %p77_p6, %p45_p1  ;;  %p310_p12 = scmp.ge.s32.totalorder %s506_s11, 2 }
   0xf   : > { %s578_s20 = scalar_select %p36_p7, %s494_s8, %s38_s15  }
  0x10   : > { %p580_p11 = por %p83_p10, %p51_p3  ;;  %p336_p13 = scmp.lt.s32.totalorder %s506_s11, 2 }
  0x11   : > { %s103_s22 = sand.u32 1, %s494_s8   ;;  %s322_s24 = sshll.u32 %s502_s10, 3 }
  0x12   : > { %s311_s23 = sshll.u32 %s103_s22, 3  ;;  %s113_s27 = scalar_lea.hbm %s646_s0, %s322_s24 }
  0x13   : > { %s107_s28 = scalar_lea.vmem [#allocation2], %s311_s23  ;;  %s114_s30 = sshll.u32 %s113_s27, 4  ;;  %s115_s30 = int_to_ptr.hbm [resolvable:$true] %s114_s30 }
  0x14   : > { %s116_s29 = sshll.u32 %s107_s28, 4  ;;  %p329_p0 = pnand %p336_p13, %p563_p4  ;;  %s117_s29 = int_to_ptr.vmem [resolvable:$true] %s116_s29 }
  0x15   : > { %p314_p1 = scmp.ge.s32.totalorder %s506_s11, 1  ;;  %s104_s2 = scalar_lea.sflag [#allocation3], %s103_s22 }
  0x16   : > { %s508_s3 = smov 32   ;;  %s509_s4 = smov 2  }
  0x17   : > { %331 = dma.hbm_to_vmem [thread:$0]  (!%p329_p0), %s115_s30, 128, %s117_s29, %s104_s2, %s508_s3, %s508_s3, %s509_s4  }
  0x18   : > { %p124_p2 = scmp.lt.s32.totalorder %s506_s11, 3 }
  0x1a   : > { %p125_p3 = pnand %p314_p1, %p124_p2 }
  0x1b   : > { %s596_s5 = sand.u32 (!%p125_p3), 1, %s490_s7  }
  0x1c   : > { %128 = sbr.rel (%p125_p3) target bundleno = 93 (0x5d), region = 24  ;;  %s315_s12 = sshll.u32 (!%p125_p3), %s596_s5, 3 }
  0x1d   : > { %s131_s13 = scalar_lea.sflag (!%p125_p3), [#allocation3], %s596_s5  ;;  %s134_s15 = scalar_lea.vmem (!%p125_p3), [#allocation2], %s315_s12 }
  0x21   : > { %477 = dma.done.wait (%p569_p8), %s131_s13, 128  }
  0x22   : > { %479 = vsyncadd (%p569_p8), %s131_s13, 4294967168  ;;  %vm162_vm0 = vcmask 1041408   ;;  %v154_v0 = vld [vmem:[%s134_s15] sm:$0x3]  ;;  %v155_v1 = vld [vmem:[%s134_s15 + $0x2] sm:$0x3] }
  0x23   : > { %v156_v2 = vld [vmem:[%s134_s15 + $0x4] sm:$0x3]  ;;  %v157_v3 = vld [vmem:[%s134_s15 + $0x6] sm:$0x3]  ;;  %v158_v4 = vmul.f32 %v154_v0, %v154_v0  ;;  %v159_v5 = vmul.f32 %v155_v1, %v155_v1  ;;  %s323_s16 = sshll.u32 %s498_s9, 3  ;;  %s153_s23 = scalar_lea.vmem [#allocation5], %s315_s12 }
  0x24   : > { %v160_v6 = vmul.f32 %v156_v2, %v156_v2  ;;  %v161_v7 = vmul.f32 %v157_v3, %v157_v3  ;;  %s218_s22 = scalar_lea.hbm %s647_s1, %s323_s16  ;;  %s219_s24 = sshll.u32 %s153_s23, 4  ;;  %s220_s24 = int_to_ptr.vmem [resolvable:$true] %s219_s24 }
  0x25   : > { %v163_v8 = vsel %vm162_vm0, %v158_v4, 0.0  ;;  %v164_v9 = vsel %vm162_vm0, %v159_v5, 0.0  ;;  %s221_s25 = sshll.u32 %s218_s22, 4  ;;  %s206_s9 = scalar_lea.sflag [#allocation4], %s596_s5  ;;  %s222_s25 = int_to_ptr.hbm [resolvable:$true] %s221_s25 }
  0x26   : > { %v166_v10 = vsel %vm162_vm0, %v160_v6, 0.0  ;;  %v165_v11 = vadd.f32 %v164_v9, %v163_v8  ;;  %v168_v12 = vsel %vm162_vm0, %v161_v7, 0.0  ;;  %s438_s26 = sshra.s32 %s222_s25, 4  ;;  %s444_s30 = scalar_lea.hbm %s647_s1, 16  ;;  %s439_s26 = int_to_ptr.hbm [resolvable:$true] %s438_s26 }
  0x27   : > { %s440_s27 = scalar_lea.hbm %s439_s26, 8  ;;  %p445_p7 = scmp.lt.s32.totalorder %s439_s26, %s647_s1 }
  0x28   : > { %v167_v13 = vadd.f32 %v166_v10, %v165_v11  ;;  %p441_p4 = scmp.ne.s32.totalorder %s439_s26, %s440_s27  ;;  %p446_p8 = scmp.lt.s32.totalorder %s444_s30, %s440_s27 }
  0x2a   : > { %v169_v14 = vadd.f32 %v168_v12, %v167_v13  ;;  %p442_p5 = pnand %p441_p4, %p573_p9  ;;  %p447_p10 = por %p446_p8, %p445_p7 }
  0x2c   : > { %390 = vrsqrt.f32 %v169_v14  ;;  %vm177_vm1 = vcmp.eq.f32.partialorder %v169_v14, inf  ;;  %v180_v21 = vand.u32 2147483648, %v169_v14  ;;  %vm179_vm2 = vcmp.eq.f32.partialorder %v169_v14, 0.0  ;;  %p443_p6 = pneg %p442_p5 }
  0x2e   : > { %p448_p13 = pnand %p447_p10, %p443_p6 }
  0x32   : > { %v391_v15 = vpop.eup %390 }
  0x33   : > { %v171_v16 = vmul.f32 %v391_v15, %v169_v14 }
  0x35   : > { %v172_v17 = vmul.f32 %v391_v15, %v171_v16 }
  0x37   : > { %v173_v18 = vmul.f32 0.5, %v172_v17 }
  0x39   : > { %v174_v19 = vsub.f32 1.5, %v173_v18 }
  0x3b   : > { %v175_v20 = vmul.f32 %v391_v15, %v174_v19 }
  0x3d   : > { %v176_v22 = vmul.f32 %v175_v20, %v169_v14 }
  0x3f   : > { %v178_v23 = vsel %vm177_vm1, %v169_v14, %v176_v22 }
  0x40   : > { %v181_v24 = vsel %vm179_vm2, %v180_v21, %v178_v23 }
  0x41   : > { %v182_v25 = vadd.f32 1e-06, %v181_v24 }
  0x43   : > { %392 = vrcp.f32 %v182_v25  ;;  %v194_v28 = vand.u32 2147483648, %v182_v25  ;;  %vm188_vm3 = vweird.f32 %v182_v25  ;;  %v192_v30 = vand.u32 2147483647, %v182_v25 }
  0x45   : > { %v195_v32 = vor.u32 1.1754944e-38, %v194_v28  ;;  %vm193_vm6 = vcmp.eq.f32.partialorder %v192_v30, 8.507059e+37 }
  0x49   : > { %v393_v26 = vpop.eup %392 }
  0x4a   : > { %v184_v27 = vmul.f32 %v393_v26, %v182_v25  ;;  %vm189_vm4 = vweird.f32 %v393_v26 }
  0x4b   : > { %vm190_vm5 = vmor %vm188_vm3, %vm189_vm4 }
  0x4c   : > { %v185_v29 = vsub.f32 1.0, %v184_v27 }
  0x4e   : > { %v186_v31 = vmul.f32 %v393_v26, %v185_v29 }
  0x50   : > { %v187_v33 = vadd.f32 %v393_v26, %v186_v31 }
  0x52   : > { %v191_v34 = vsel %vm190_vm5, %v393_v26, %v187_v33 }
  0x53   : > { %v196_v35 = vsel %vm193_vm6, %v195_v32, %v191_v34 }
  0x54   : > { %v197_v36 = vmul.f32 %v196_v35, %v154_v0  ;;  %v198_v37 = vmul.f32 %v196_v35, %v155_v1  ;;  %v199_v38 = vmul.f32 %v196_v35, %v156_v2  ;;  %v200_v39 = vmul.f32 %v196_v35, %v157_v3 }
  0x56   : > { %201 = vst [vmem:[%s153_s23] sm:$0x3] %v197_v36 }
  0x57   : > { %202 = vst [vmem:[%s153_s23 + $0x2] sm:$0x3] %v198_v37 }
  0x58   : > { %203 = vst [vmem:[%s153_s23 + $0x4] sm:$0x3] %v199_v38 }
  0x59   : > { %204 = vst [vmem:[%s153_s23 + $0x6] sm:$0x3] %v200_v39 }
  0x5a   : > { %451 = shalt.err (!%p448_p13)
}
  0x5b   : > { %s510_s4 = smov 32   ;;  %s511_s5 = smov 2  }
  0x5c   : > { %326 = dma.vmem_to_hbm [thread:$0]  (%p573_p9), %s220_s24, 128, %s222_s25, %s206_s9, %s510_s4, %s510_s4, %s511_s5  }
  0x5d PF: > { %s236_s12 = sand.u32 1, %s486_s6   ;;  %p333_p0 = pnand %p310_p12, %p580_p11 }
  0x5e   : > { %s237_s13 = scalar_lea.sflag [#allocation4], %s236_s12 }
  0x5f   : > { %p334_p1 = pneg %p333_p0 }
  0x61   : > { %481 = dma.done.wait (%p334_p1), %s237_s13, 128  }
  0x62   : > { %483 = vsyncadd (%p334_p1), %s237_s13, 4294967168  ;;  %s17_s11 = sadd.s32 1, %s506_s11   ;;  %s652_s6 = smov %s490_s7 }
  0x63   : > { %p14_p2 = scmp.ge.s32.totalorder %s17_s11, 4   ;;  %s653_s7 = smov %s494_s8 }
  0x64   : > { %s654_s8 = smov %s578_s20  ;;  %s655_s9 = smov %s502_s10 }
  0x65   : > { %s656_s10 = smov %s658_s14  ;;  %16 = sbr.rel (!%p14_p2) target bundleno = 6 (0x6), region = 69 }
  0x6a   :  { %243 = vsyncpa [#allocation3], 1 }
  0x6b   :  { %245 = vsyncpa [#allocation3 + $0x1], 1 }
  0x6c   :  { %246 = vsyncpa [#allocation4], 1 }
  0x6d   :  { %248 = vsyncpa [#allocation4 + $0x1], 1 }

</bundles_post_ra>
